<compile_context>
chip_gen: v6e
topology: v6e:2x2x1
jax: 0.10.0
libtpu: 0.0.40
codegen_flags: <defaults>
</compile_context>

<pallas_src>
import functools
import math

import jax
import jax.numpy as jnp
import numpy as np
from jax.experimental import pallas as pl
from jax.experimental.pallas import tpu as pltpu


def _chebynet_kernel(x_ref, l_ref, w_ref, o_ref, *, k_order, mxu_dtype):
    """One grid step = one tile of TB batch elements, folded into lanes.

    x_ref : (N, TB*Fin)           VMEM, f32        (batch-folded feature slab)
    l_ref : (N, N)                VMEM, mxu_dtype  (resident, batch-invariant)
    w_ref : (K, TB*Fin, TB*Fout)  VMEM, mxu_dtype  (resident block-diag fused weights)
    o_ref : (N, TB*Fout)          VMEM, f32
    """
    f32 = jnp.float32
    lmat = l_ref[...]                                 # already mxu_dtype
    ax = x_ref[...].astype(mxu_dtype)                 # ax_0 = x   (adj[0] = I)

    # k = 0 term.
    acc = jnp.dot(ax, w_ref[0], preferred_element_type=f32)

    # k >= 1 terms: propagate ax_k = L @ ax_{k-1} and accumulate immediately
    # (no lane-unaligned concatenation, no scratch slab, small live ranges).
    for k in range(1, k_order):
        ax = jnp.dot(lmat, ax, preferred_element_type=f32).astype(mxu_dtype)
        acc = acc + jnp.dot(ax, w_ref[k], preferred_element_type=f32)

    o_ref[...] = jnp.maximum(acc, 0.0).astype(o_ref.dtype)


def _pick_batch_tile(B, N, Fin, Fout, K, vmem_budget_bytes=20 * 1024 * 1024):
    """Pick TB (batch elements folded into the lane dim per grid step).

    When the batch is split into multiple tiles, TB*Fin and TB*Fout must be
    multiples of 128 so the lane-dim blocks are tile-aligned; otherwise take
    the whole batch in one step (block == full array, always legal)."""
    align_in = 128 // math.gcd(Fin, 128)
    align_out = 128 // math.gcd(Fout, 128)
    t_align = align_in * align_out // math.gcd(align_in, align_out)
    if B <= t_align:
        return B

    def footprint(tb):
        # double-buffered streamed blocks + resident L / block-diag weights (f32 bound)
        return 2 * 4 * N * tb * (Fin + Fout) + 4 * (N * N + K * tb * Fin * tb * Fout)

    tb = t_align
    while (tb * 2 <= B and tb * 2 <= 16 * t_align
           and footprint(tb * 2) <= vmem_budget_bytes):
        tb *= 2
    return tb


def _pick_vmem_limit(est_bytes):
    cap = 128 * 1024 * 1024
    try:  # clamp to the actual chip (v7x only has 64 MiB VMEM per TensorCore)
        cap = int(pltpu.get_tpu_info().vmem_capacity_bytes)
    except Exception:
        pass
    want = max(32 * 1024 * 1024, 2 * int(est_bytes))
    return int(min(want, int(0.8 * cap)))


def chebynet_forward(x, L, weights, *, mxu_dtype=jnp.float32, batch_tile=None):
    """x: (B, N, Fin) f32, L: (N, N) f32, weights: (K, Fin, Fout) f32 -> (B, N, Fout).

    mxu_dtype=jnp.bfloat16 runs the matmuls on the bf16 MXU fast path (v6e/v7x)
    with f32 accumulation; jnp.float32 keeps full input precision."""
    B, N, Fin = x.shape
    K, _, Fout = weights.shape

    TB = int(batch_tile) if batch_tile is not None else _pick_batch_tile(B, N, Fin, Fout, K)
    TB = max(1, min(TB, B))
    Bp = ((B + TB - 1) // TB) * TB      # padded batch; padded rows are zeros -> relu(0)=0
    n_tiles = Bp // TB

    xp = x if Bp == B else jnp.pad(x, ((0, Bp - B), (0, 0), (0, 0)))
    # Fold batch into the lane dimension: (Bp, N, Fin) -> (N, Bp*Fin).
    x_slab = jnp.transpose(xp, (1, 0, 2)).reshape(N, Bp * Fin)

    # Block-diagonal fused weights: W_bd[k] = kron(I_TB, W_k), shape (TB*Fin, TB*Fout).
    eye_tb = jnp.eye(TB, dtype=weights.dtype)
    w_bd = jnp.stack([jnp.kron(eye_tb, weights[k]) for k in range(K)], axis=0)
    w_bd = w_bd.astype(mxu_dtype)
    l_in = L.astype(mxu_dtype)

    kernel = functools.partial(_chebynet_kernel, k_order=K, mxu_dtype=mxu_dtype)

    mxu_item = jnp.dtype(mxu_dtype).itemsize
    flops = Bp * ((K - 1) * 2 * N * N * Fin + K * 2 * N * TB * Fin * Fout)
    bytes_accessed = (4 * N * Bp * (Fin + Fout)
                      + mxu_item * (N * N + K * TB * Fin * TB * Fout))
    vmem_est = (2 * 4 * N * TB * (Fin + Fout)
                + 2 * mxu_item * (N * N + K * TB * Fin * TB * Fout))

    compiler_params = pltpu.CompilerParams(
        dimension_semantics=("parallel",),
        vmem_limit_bytes=_pick_vmem_limit(vmem_est))
    cost = pl.CostEstimate(flops=int(flops), transcendentals=0,
                           bytes_accessed=int(bytes_accessed))

    def build(resident_mode):
        def resident_spec(shape):
            kwargs = {} if resident_mode is None else {"pipeline_mode": resident_mode}
            return pl.BlockSpec(shape, lambda *_: (0,) * len(shape), **kwargs)

        return pl.pallas_call(
            kernel,
            out_shape=jax.ShapeDtypeStruct((N, Bp * Fout), x.dtype),
            grid=(n_tiles,),
            in_specs=[
                pl.BlockSpec((N, TB * Fin), lambda i: (0, i)),     # streamed x tile
                resident_spec((N, N)),                             # resident L
                resident_spec((K, TB * Fin, TB * Fout)),           # resident fused weights
            ],
            out_specs=pl.BlockSpec((N, TB * Fout), lambda i: (0, i)),
            compiler_params=compiler_params,
            cost_estimate=cost,
        )

    try:
        # Single-buffer the batch-invariant residents (halves their VMEM footprint).
        out_slab = jax.block_until_ready(build(pl.Buffered(1))(x_slab, l_in, w_bd))
    except Exception:
        # Installed Pallas rejects pipeline_mode here -> default double-buffering.
        out_slab = build(None)(x_slab, l_in, w_bd)

    # Un-fold: (N, Bp*Fout) -> (Bp, N, Fout), drop any batch padding.
    out = jnp.transpose(out_slab.reshape(N, Bp, Fout), (1, 0, 2))
    return out[:B] if Bp != B else out


def chebynet_reference(x, L, weights):
    """Pure-JAX reference mirroring the PyTorch module exactly (HIGHEST precision)."""
    K = weights.shape[0]
    N = L.shape[1]
    hi = jax.lax.Precision.HIGHEST
    support = []
    for k in range(K):
        if k == 0:
            support.append(jnp.eye(N, dtype=x.dtype))
        elif k == 1:
            support.append(L)
        else:
            support.append(jnp.matmul(support[-1], L, precision=hi))
    result = None
    for k in range(K):
        out = jnp.matmul(support[k], x, precision=hi)       # (B, N, Fin) via broadcasting
        out = jnp.matmul(out, weights[k], precision=hi)     # (B, N, Fout)
        result = out if result is None else result + out
    return jax.nn.relu(result)


if __name__ == "__main__":
    # Small shapes consistent with the module: batch=2, nodes=16, in_dim=32,
    # out_dim=32, hid_layers=3 (Chebyshev order).
    B, N, Fin, Fout, K = 2, 16, 32, 32, 3

    key = jax.random.PRNGKey(0)
    kx, kl, kw = jax.random.split(key, 3)

    x = jax.random.normal(kx, (B, N, Fin), dtype=jnp.float32)
    L = jax.random.normal(kl, (N, N), dtype=jnp.float32) / math.sqrt(N)

    # Deterministic Xavier-normal init for each GraphConvolution weight (num_in, num_out).
    xavier_std = math.sqrt(2.0 / (Fin + Fout))
    weights = xavier_std * jax.random.normal(kw, (K, Fin, Fout), dtype=jnp.float32)

    ref = np.asarray(chebynet_reference(x, L, weights))

    # f32 path. Tolerance covers the L@(L@x) vs (L@L)@x reassociation and the
    # TPU matmul default-precision behaviour on either side of the comparison.
    out = jax.block_until_ready(chebynet_forward(x, L, weights))
    np.testing.assert_allclose(np.asarray(out), ref, rtol=2e-2, atol=2e-2)

    # bf16-on-MXU path (v6e/v7x fast path), f32 accumulation; loosened tolerance.
    out_bf16 = jax.block_until_ready(
        chebynet_forward(x, L, weights, mxu_dtype=jnp.bfloat16))
    np.testing.assert_allclose(np.asarray(out_bf16), ref, rtol=6e-2, atol=6e-2)

    print("KERNEL_OK")
</pallas_src>

<mosaic_0001>
module attributes {stable_mosaic.version = 11 : i64} {
  func.func @_chebynet_kernel(%arg0: i32, %arg1: memref<16x64xf32, #tpu.memory_space<vmem>>, %arg2: memref<16x16xf32, #tpu.memory_space<vmem>>, %arg3: memref<3x64x64xf32, #tpu.memory_space<vmem>>, %arg4: memref<16x64xf32, #tpu.memory_space<vmem>>) attributes {dimension_semantics = [#tpu.dimension_semantics<parallel>], iteration_bounds = array<i64: 1>, scalar_prefetch = 0 : i64, scratch_operands = 0 : i64, tpu.core_type = #tpu.core_type<tc>, window_params = [{transform_indices = @transform_0, window_bounds = array<i64: 16, 64>}, {pipeline_mode = #tpu.pipeline_mode<synchronous>, transform_indices = @transform_1, window_bounds = array<i64: 16, 16>}, {pipeline_mode = #tpu.pipeline_mode<synchronous>, transform_indices = @transform_2, window_bounds = array<i64: 3, 64, 64>}, {transform_indices = @transform_3, window_bounds = array<i64: 16, 64>}]} {
    %c0 = arith.constant 0 : index
    %c0_0 = arith.constant 0 : index
    %0 = vector.load %arg2[%c0, %c0_0] : memref<16x16xf32, #tpu.memory_space<vmem>>, vector<16x16xf32>
    %c0_1 = arith.constant 0 : index
    %c0_2 = arith.constant 0 : index
    %1 = vector.load %arg1[%c0_1, %c0_2] : memref<16x64xf32, #tpu.memory_space<vmem>>, vector<16x64xf32>
    %c0_3 = arith.constant 0 : index
    %c0_4 = arith.constant 0 : index
    %c0_5 = arith.constant 0 : index
    %2 = vector.load %arg3[%c0_3, %c0_4, %c0_5] : memref<3x64x64xf32, #tpu.memory_space<vmem>>, vector<1x64x64xf32>
    %3 = vector.shape_cast %2 : vector<1x64x64xf32> to vector<64x64xf32>
    %cst = arith.constant dense<0.000000e+00> : vector<16x64xf32>
    %4 = tpu.matmul %1, %3, %cst {dimension_numbers = #tpu.dot_dimension_numbers<[1], [0], [0], [1], [0, 0, 1, 1], [], []>} : vector<16x64xf32>, vector<64x64xf32>, vector<16x64xf32> -> vector<16x64xf32>
    %cst_6 = arith.constant dense<0.000000e+00> : vector<16x64xf32>
    %5 = tpu.matmul %0, %1, %cst_6 {dimension_numbers = #tpu.dot_dimension_numbers<[1], [0], [0], [1], [0, 0, 1, 1], [], []>} : vector<16x16xf32>, vector<16x64xf32>, vector<16x64xf32> -> vector<16x64xf32>
    %c1 = arith.constant 1 : index
    %c0_7 = arith.constant 0 : index
    %c0_8 = arith.constant 0 : index
    %6 = vector.load %arg3[%c1, %c0_7, %c0_8] : memref<3x64x64xf32, #tpu.memory_space<vmem>>, vector<1x64x64xf32>
    %7 = vector.shape_cast %6 : vector<1x64x64xf32> to vector<64x64xf32>
    %cst_9 = arith.constant dense<0.000000e+00> : vector<16x64xf32>
    %8 = tpu.matmul %5, %7, %cst_9 {dimension_numbers = #tpu.dot_dimension_numbers<[1], [0], [0], [1], [0, 0, 1, 1], [], []>} : vector<16x64xf32>, vector<64x64xf32>, vector<16x64xf32> -> vector<16x64xf32>
    %9 = arith.addf %4, %8 : vector<16x64xf32>
    %cst_10 = arith.constant dense<0.000000e+00> : vector<16x64xf32>
    %10 = tpu.matmul %0, %5, %cst_10 {dimension_numbers = #tpu.dot_dimension_numbers<[1], [0], [0], [1], [0, 0, 1, 1], [], []>} : vector<16x16xf32>, vector<16x64xf32>, vector<16x64xf32> -> vector<16x64xf32>
    %c2 = arith.constant 2 : index
    %c0_11 = arith.constant 0 : index
    %c0_12 = arith.constant 0 : index
    %11 = vector.load %arg3[%c2, %c0_11, %c0_12] : memref<3x64x64xf32, #tpu.memory_space<vmem>>, vector<1x64x64xf32>
    %12 = vector.shape_cast %11 : vector<1x64x64xf32> to vector<64x64xf32>
    %cst_13 = arith.constant dense<0.000000e+00> : vector<16x64xf32>
    %13 = tpu.matmul %10, %12, %cst_13 {dimension_numbers = #tpu.dot_dimension_numbers<[1], [0], [0], [1], [0, 0, 1, 1], [], []>} : vector<16x64xf32>, vector<64x64xf32>, vector<16x64xf32> -> vector<16x64xf32>
    %14 = arith.addf %9, %13 : vector<16x64xf32>
    %cst_14 = arith.constant 0.000000e+00 : f32
    %15 = vector.broadcast %cst_14 : f32 to vector<16x64xf32>
    %16 = arith.maximumf %14, %15 : vector<16x64xf32>
    %c0_15 = arith.constant 0 : index
    %c0_16 = arith.constant 0 : index
    %17 = vector.load %arg4[%c0_15, %c0_16] : memref<16x64xf32, #tpu.memory_space<vmem>>, vector<16x64xf32>
    tpu.vector_store %arg4[%c0_15, %c0_16], %16 {strides = array<i32>} : memref<16x64xf32, #tpu.memory_space<vmem>>, vector<16x64xf32>,
    return
  }
  func.func @transform_0(%arg0: i32) -> (i32, i32) {
    %c0_i32 = arith.constant 0 : i32
    %c0_i32_0 = arith.constant 0 : i32
    return %c0_i32, %arg0 : i32, i32
  }
  func.func @transform_1(%arg0: i32) -> (i32, i32) {
    %c0_i32 = arith.constant 0 : i32
    %c0_i32_0 = arith.constant 0 : i32
    %c0_i32_1 = arith.constant 0 : i32
    return %c0_i32, %c0_i32_0 : i32, i32
  }
  func.func @transform_2(%arg0: i32) -> (i32, i32, i32) {
    %c0_i32 = arith.constant 0 : i32
    %c0_i32_0 = arith.constant 0 : i32
    %c0_i32_1 = arith.constant 0 : i32
    %c0_i32_2 = arith.constant 0 : i32
    return %c0_i32, %c0_i32_0, %c0_i32_1 : i32, i32, i32
  }
  func.func @transform_3(%arg0: i32) -> (i32, i32) {
    %c0_i32 = arith.constant 0 : i32
    %c0_i32_0 = arith.constant 0 : i32
    return %c0_i32, %arg0 : i32, i32
  }
}

module attributes {stable_mosaic.version = 11 : i64} {
  func.func @_chebynet_kernel(%arg0: i32, %arg1: memref<16x64xf32, #tpu.memory_space<vmem>>, %arg2: memref<16x16xf32, #tpu.memory_space<vmem>>, %arg3: memref<3x64x64xf32, #tpu.memory_space<vmem>>, %arg4: memref<16x64xf32, #tpu.memory_space<vmem>>) attributes {dimension_semantics = [#tpu.dimension_semantics<parallel>], iteration_bounds = array<i64: 1>, scalar_prefetch = 0 : i64, scratch_operands = 0 : i64, tpu.core_type = #tpu.core_type<tc>, window_params = [{transform_indices = @transform_0, window_bounds = array<i64: 16, 64>}, {pipeline_mode = #tpu.pipeline_mode<synchronous>, transform_indices = @transform_1, window_bounds = array<i64: 16, 16>}, {pipeline_mode = #tpu.pipeline_mode<synchronous>, transform_indices = @transform_2, window_bounds = array<i64: 3, 64, 64>}, {transform_indices = @transform_3, window_bounds = array<i64: 16, 64>}]} {
    %c0 = arith.constant 0 : index
    %c0_0 = arith.constant 0 : index
    %0 = vector.load %arg2[%c0, %c0_0] : memref<16x16xf32, #tpu.memory_space<vmem>>, vector<16x16xf32>
    %c0_1 = arith.constant 0 : index
    %c0_2 = arith.constant 0 : index
    %1 = vector.load %arg1[%c0_1, %c0_2] : memref<16x64xf32, #tpu.memory_space<vmem>>, vector<16x64xf32>
    %c0_3 = arith.constant 0 : index
    %c0_4 = arith.constant 0 : index
    %c0_5 = arith.constant 0 : index
    %2 = vector.load %arg3[%c0_3, %c0_4, %c0_5] : memref<3x64x64xf32, #tpu.memory_space<vmem>>, vector<1x64x64xf32>
    %3 = vector.shape_cast %2 : vector<1x64x64xf32> to vector<64x64xf32>
    %cst = arith.constant dense<0.000000e+00> : vector<16x64xf32>
    %4 = tpu.matmul %1, %3, %cst {dimension_numbers = #tpu.dot_dimension_numbers<[1], [0], [0], [1], [0, 0, 1, 1], [], []>} : vector<16x64xf32>, vector<64x64xf32>, vector<16x64xf32> -> vector<16x64xf32>
    %cst_6 = arith.constant dense<0.000000e+00> : vector<16x64xf32>
    %5 = tpu.matmul %0, %1, %cst_6 {dimension_numbers = #tpu.dot_dimension_numbers<[1], [0], [0], [1], [0, 0, 1, 1], [], []>} : vector<16x16xf32>, vector<16x64xf32>, vector<16x64xf32> -> vector<16x64xf32>
    %c1 = arith.constant 1 : index
    %c0_7 = arith.constant 0 : index
    %c0_8 = arith.constant 0 : index
    %6 = vector.load %arg3[%c1, %c0_7, %c0_8] : memref<3x64x64xf32, #tpu.memory_space<vmem>>, vector<1x64x64xf32>
    %7 = vector.shape_cast %6 : vector<1x64x64xf32> to vector<64x64xf32>
    %cst_9 = arith.constant dense<0.000000e+00> : vector<16x64xf32>
    %8 = tpu.matmul %5, %7, %cst_9 {dimension_numbers = #tpu.dot_dimension_numbers<[1], [0], [0], [1], [0, 0, 1, 1], [], []>} : vector<16x64xf32>, vector<64x64xf32>, vector<16x64xf32> -> vector<16x64xf32>
    %9 = arith.addf %4, %8 : vector<16x64xf32>
    %cst_10 = arith.constant dense<0.000000e+00> : vector<16x64xf32>
    %10 = tpu.matmul %0, %5, %cst_10 {dimension_numbers = #tpu.dot_dimension_numbers<[1], [0], [0], [1], [0, 0, 1, 1], [], []>} : vector<16x16xf32>, vector<16x64xf32>, vector<16x64xf32> -> vector<16x64xf32>
    %c2 = arith.constant 2 : index
    %c0_11 = arith.constant 0 : index
    %c0_12 = arith.constant 0 : index
    %11 = vector.load %arg3[%c2, %c0_11, %c0_12] : memref<3x64x64xf32, #tpu.memory_space<vmem>>, vector<1x64x64xf32>
    %12 = vector.shape_cast %11 : vector<1x64x64xf32> to vector<64x64xf32>
    %cst_13 = arith.constant dense<0.000000e+00> : vector<16x64xf32>
    %13 = tpu.matmul %10, %12, %cst_13 {dimension_numbers = #tpu.dot_dimension_numbers<[1], [0], [0], [1], [0, 0, 1, 1], [], []>} : vector<16x64xf32>, vector<64x64xf32>, vector<16x64xf32> -> vector<16x64xf32>
    %14 = arith.addf %9, %13 : vector<16x64xf32>
    %cst_14 = arith.constant 0.000000e+00 : f32
    %15 = vector.broadcast %cst_14 : f32 to vector<16x64xf32>
    %16 = arith.maximumf %14, %15 : vector<16x64xf32>
    %c0_15 = arith.constant 0 : index
    %c0_16 = arith.constant 0 : index
    %17 = vector.load %arg4[%c0_15, %c0_16] : memref<16x64xf32, #tpu.memory_space<vmem>>, vector<16x64xf32>
    tpu.vector_store %arg4[%c0_15, %c0_16], %16 {strides = array<i32>} : memref<16x64xf32, #tpu.memory_space<vmem>>, vector<16x64xf32>,
    return
  }
  func.func @transform_0(%arg0: i32) -> (i32, i32) {
    %c0_i32 = arith.constant 0 : i32
    %c0_i32_0 = arith.constant 0 : i32
    return %c0_i32, %arg0 : i32, i32
  }
  func.func @transform_1(%arg0: i32) -> (i32, i32) {
    %c0_i32 = arith.constant 0 : i32
    %c0_i32_0 = arith.constant 0 : i32
    %c0_i32_1 = arith.constant 0 : i32
    return %c0_i32, %c0_i32_0 : i32, i32
  }
  func.func @transform_2(%arg0: i32) -> (i32, i32, i32) {
    %c0_i32 = arith.constant 0 : i32
    %c0_i32_0 = arith.constant 0 : i32
    %c0_i32_1 = arith.constant 0 : i32
    %c0_i32_2 = arith.constant 0 : i32
    return %c0_i32, %c0_i32_0, %c0_i32_1 : i32, i32, i32
  }
  func.func @transform_3(%arg0: i32) -> (i32, i32) {
    %c0_i32 = arith.constant 0 : i32
    %c0_i32_0 = arith.constant 0 : i32
    return %c0_i32, %arg0 : i32, i32
  }
}

</mosaic_0001>

<bundles_post_ra>
// kernel: tpu_custom_call.1
= control target key start
LH: loop header
LB: loop body
LE: loop exit
PB: predicated region body
PF: predicated region fallthrough
CT: control target
= control target key end

     0   :  { %8 = vsyncpa [#allocation3], 0  ;;  %s792_s0 = inlined_call_operand.hbm [shape: f32[16,64], index: 0, kind: input, shape index: {}]   ;;  %s793_s1 = inlined_call_operand.hbm [shape: f32[16,16], index: 1, kind: input, shape index: {}]   ;;  %s794_s2 = inlined_call_operand.hbm [shape: f32[3,64,64], index: 2, kind: input, shape index: {}]   ;;  %s795_s3 = inlined_call_operand.hbm [shape: f32[16,64], index: 3, kind: output, shape index: {}]  }
   0x1   :  { %9 = vsyncpa [#allocation6], 0 }
   0x2   :  { %10 = vsyncpa [#allocation4], 0  ;;  %s722_s12 = smov [#allocation5]   ;;  %s723_s14 = smov [#allocation2]  }
   0x3   :  { %s28_s13 = sshll.u32 %s722_s12, 4  ;;  %s16_s15 = sshll.u32 %s723_s14, 4  ;;  %s29_s13 = int_to_ptr.vmem [resolvable:$true] %s28_s13  ;;  %s17_s15 = int_to_ptr.vmem [resolvable:$true] %s16_s15 }
   0x4   :  { %s644_s16 = scalar_lea.vmem %s29_s13, 256  ;;  %p649_p1 = scmp.lt.s32.totalorder %s29_s13, %s29_s13 }
   0x5   :  { %p645_p0 = scmp.ne.s32.totalorder %s29_s13, %s644_s16  ;;  %p650_p2 = scmp.lt.s32.totalorder %s644_s16, %s644_s16 }
   0x7   :  { %p651_p3 = por %p650_p2, %p649_p1 }
   0x9   :  { %p652_p4 = pnand %p651_p3, %p645_p0 }
   0xb   :  { %655 = shalt.err (!%p652_p4)
}
   0xc   :  { %s724_s17 = smov 128   ;;  %s725_s18 = smov 8  }
   0xd   :  { %34 = dma.hbm_to_vmem [thread:$0]  %s793_s1, 256, %s29_s13, [#allocation6], %s724_s17, %s724_s17, %s725_s18  }
   0xe   :  { %s664_s21 = scalar_lea.vmem %s17_s15, 256  ;;  %p669_p6 = scmp.lt.s32.totalorder %s17_s15, %s17_s15 }
   0xf   :  { %p665_p5 = scmp.ne.s32.totalorder %s17_s15, %s664_s21  ;;  %p670_p7 = scmp.lt.s32.totalorder %s664_s21, %s664_s21 }
  0x11   :  { %p671_p8 = por %p670_p7, %p669_p6 }
  0x13   :  { %p672_p9 = pnand %p671_p8, %p665_p5 }
  0x15   :  { %675 = shalt.err (!%p672_p9)
}
  0x16   :  { %22 = dma.hbm_to_vmem [thread:$0]  %s792_s0, 256, %s17_s15, [#allocation3], %s724_s17, %s724_s17, %s725_s18  }
  0x17   :  { %s726_s24 = smov [#allocation7]  }
  0x18   :  { %s40_s25 = sshll.u32 %s726_s24, 4  ;;  %s41_s25 = int_to_ptr.vmem [resolvable:$true] %s40_s25 }
  0x19   :  { %s684_s26 = scalar_lea.vmem %s41_s25, 3072  ;;  %p689_p11 = scmp.lt.s32.totalorder %s41_s25, %s41_s25 }
  0x1a   :  { %p685_p10 = scmp.ne.s32.totalorder %s41_s25, %s684_s26  ;;  %p690_p12 = scmp.lt.s32.totalorder %s684_s26, %s684_s26 }
  0x1c   :  { %p691_p13 = por %p690_p12, %p689_p11 }
  0x1e   :  { %p692_p0 = pnand %p691_p13, %p685_p10 }
  0x20   :  { %695 = shalt.err (!%p692_p0)
}
  0x21   :  { %46 = dma.hbm_to_vmem [thread:$0]  %s794_s2, 3072, %s41_s25, [#allocation6], %s724_s17, %s724_s17, %s725_s18  }
  0x22   :  { %716 = dma.done.wait [#allocation3], 256  }
  0x23   :  { %717 = vsyncadd [#allocation3], 4294967040 }
  0x24   :  { %718 = dma.done.wait [#allocation6], 3328  }
  0x25   :  { %719 = vsyncadd [#allocation6], 4294963968  ;;  %vm68_vm0 = vcmask 130048   ;;  %v59_v0 = vld [vmem:[#allocation2 + $0x8] sm:$0xff]  ;;  %v58_v1 = vld [vmem:[#allocation2] sm:$0xff]  ;;  %vm159_vm1 = vcmask 523264  }
  0x26   :  { %v766_v2 = vld [vmem:[#allocation5] sm:$0xff]  ;;  %559 = vmatprep.subr.mxu1 %v59_v0  ;;  %v770_v3 = vld [vmem:[#allocation5 + $0x8] sm:$0xff]  ;;  %v65_v8 = vld [vmem:[#allocation7 + $0x28] sm:$0xff]  ;;  %601 = vmatprep.mubr.msk.f32.mxu0 %vm159_vm1, %v58_v1  ;;  %s727_s0 = smov [#allocation8]  }
  0x27   :  { %563 = vmatprep.mubr.msk.f32.mxu1 %vm68_vm0, %v766_v2  ;;  %560 = vmatpush3.msra.mxu1 %v59_v0  ;;  %v158_v4 = vld [vmem:[#allocation7 + $0x78] sm:$0xff]  ;;  %v66_v6 = vld [vmem:[#allocation7 + $0x30] sm:$0xff]  ;;  %v156_v9 = vld [vmem:[#allocation7 + $0x68] sm:$0xff]  ;;  %s498_s2 = sshll.u32 %s727_s0, 4  ;;  %s499_s2 = int_to_ptr.vmem [resolvable:$true] %s498_s2 }
  0x28   :  { %v67_v5 = vld [vmem:[#allocation7 + $0x38] sm:$0xff]  ;;  %561 = vmatprep.subr.mxu1 %v58_v1  ;;  %v157_v7 = vld [vmem:[#allocation7 + $0x70] sm:$0xff]  ;;  %v64_v10 = vld [vmem:[#allocation7 + $0x20] sm:$0xff]  ;;  %s696_s28 = scalar_lea.vmem %s499_s2, 256  ;;  %p701_p2 = scmp.lt.s32.totalorder %s499_s2, %s499_s2 }
  0x29   :  { %585 = vmatprep.subr.mxu0 %v67_v5  ;;  %562 = vmatpush3.msra.mxu1 %v58_v1  ;;  %v155_v11 = vld [vmem:[#allocation7 + $0x60] sm:$0xff]  ;;  %v63_v12 = vld [vmem:[#allocation7 + $0x18] sm:$0xff]  ;;  %v62_v14 = vld [vmem:[#allocation7 + $0x10] sm:$0xff]  ;;  %p697_p1 = scmp.ne.s32.totalorder %s499_s2, %s696_s28  ;;  %p702_p3 = scmp.lt.s32.totalorder %s696_s28, %s696_s28 }
  0x2a   :  { %586 = vmatpush3.msra.mxu0 %v67_v5  ;;  %564 = vmatmul.mubr.msk.f32.vlgmr.msra.gmra.mxu1 %vm68_vm0, %v770_v3  ;;  %v154_v13 = vld [vmem:[#allocation7 + $0x58] sm:$0xff]  ;;  %v153_v15 = vld [vmem:[#allocation7 + $0x50] sm:$0xff]  ;;  %v152_v16 = vld [vmem:[#allocation7 + $0x48] sm:$0xff] }
  0x2b   :  { %566 = vmatprep.subr.mxu1 %v158_v4  ;;  %587 = vmatprep.subr.mxu0 %v66_v6  ;;  %v151_v17 = vld [vmem:[#allocation7 + $0x40] sm:$0xff]  ;;  %v61_v18 = vld [vmem:[#allocation7 + $0x8] sm:$0xff]  ;;  %v405_v20 = vld [vmem:[#allocation7 + $0xb8] sm:$0xff]  ;;  %p703_p4 = por %p702_p3, %p701_p2 }
  0x2c   :  { %567 = vmatpush3.msra.mxu1 %v158_v4  ;;  %588 = vmatpush3.msra.mxu0 %v66_v6  ;;  %v60_v19 = vld [vmem:[#allocation7] sm:$0xff]  ;;  %v404_v21 = vld [vmem:[#allocation7 + $0xb0] sm:$0xff]  ;;  %v403_v22 = vld [vmem:[#allocation7 + $0xa8] sm:$0xff] }
  0x2d   :  { %568 = vmatprep.subr.mxu1 %v157_v7  ;;  %589 = vmatprep.subr.mxu0 %v65_v8  ;;  %v402_v23 = vld [vmem:[#allocation7 + $0xa0] sm:$0xff]  ;;  %v401_v26 = vld [vmem:[#allocation7 + $0x98] sm:$0xff]  ;;  %v400_v27 = vld [vmem:[#allocation7 + $0x90] sm:$0xff]  ;;  %p704_p5 = pnand %p703_p4, %p697_p1 }
  0x2e   :  { %569 = vmatpush3.msra.mxu1 %v157_v7  ;;  %590 = vmatpush3.msra.mxu0 %v65_v8  ;;  %v399_v28 = vld [vmem:[#allocation7 + $0x88] sm:$0xff]  ;;  %v398_v29 = vld [vmem:[#allocation7 + $0x80] sm:$0xff] }
  0x2f   :  { %570 = vmatprep.subr.mxu1 %v156_v9  ;;  %591 = vmatprep.subr.mxu0 %v64_v10 }
  0x30   :  { %571 = vmatpush3.msra.mxu1 %v156_v9  ;;  %592 = vmatpush3.msra.mxu0 %v64_v10 }
  0x31   :  { %572 = vmatprep.subr.mxu1 %v155_v11  ;;  %593 = vmatprep.subr.mxu0 %v63_v12 }
  0x32   :  { %573 = vmatpush3.msra.mxu1 %v155_v11  ;;  %594 = vmatpush3.msra.mxu0 %v63_v12 }
  0x33   :  { %574 = vmatprep.subr.mxu1 %v154_v13  ;;  %595 = vmatprep.subr.mxu0 %v62_v14 }
  0x34   :  { %575 = vmatpush3.msra.mxu1 %v154_v13  ;;  %596 = vmatpush3.msra.mxu0 %v62_v14 }
  0x35   :  { %576 = vmatprep.subr.mxu1 %v153_v15  ;;  %597 = vmatprep.subr.mxu0 %v61_v18 }
  0x36   :  { %577 = vmatpush3.msra.mxu1 %v153_v15  ;;  %598 = vmatpush3.msra.mxu0 %v61_v18 }
  0x37   :  { %578 = vmatprep.subr.mxu1 %v152_v16  ;;  %599 = vmatprep.subr.mxu0 %v60_v19 }
  0x38   :  { %579 = vmatpush3.msra.mxu1 %v152_v16  ;;  %600 = vmatpush3.msra.mxu0 %v60_v19 }
  0x39   :  { %580 = vmatprep.subr.mxu1 %v151_v17  ;;  %602 = vmatmul.mubr.msk.f32.vlgmr.msra.gmra.mxu0 %vm159_vm1, %v59_v0 }
  0x3a   :  { %581 = vmatpush3.msra.mxu1 %v151_v17  ;;  %611 = vmatprep.subr.mxu0 %v405_v20 }
  0x3b   :  { %612 = vmatpush3.msra.mxu0 %v405_v20 }
  0x3c   :  { %613 = vmatprep.subr.mxu0 %v404_v21 }
  0x3d   :  { %614 = vmatpush3.msra.mxu0 %v404_v21 }
  0x3e   :  { %615 = vmatprep.subr.mxu0 %v403_v22 }
  0x3f   :  { %616 = vmatpush3.msra.mxu0 %v403_v22 }
  0x40   :  { %617 = vmatprep.subr.mxu0 %v402_v23 }
  0x41   :  { %618 = vmatpush3.msra.mxu0 %v402_v23 }
  0x42   :  { %619 = vmatprep.subr.mxu0 %v401_v26 }
  0x43   :  { %620 = vmatpush3.msra.mxu0 %v401_v26 }
  0x44   :  { %621 = vmatprep.subr.mxu0 %v400_v27 }
  0x45   :  { %622 = vmatpush3.msra.mxu0 %v400_v27 }
  0x46   :  { %623 = vmatprep.subr.mxu0 %v399_v28 }
  0x47   :  { %624 = vmatpush3.msra.mxu0 %v399_v28 }
  0x48   :  { %625 = vmatprep.subr.mxu0 %v398_v29 }
  0x49   :  { %626 = vmatpush3.msra.mxu0 %v398_v29 }
  0xea   :  { %v565_v24 = vpop.f32.mrf.mxu1 }
  0xeb   :  { %604 = vmatprep.subr.mxu1 %v565_v24 }
  0xec   :  { %v141_v25 = vpop.f32.mrf.mxu1 }
  0xed   :  { %582 = vmatprep.mubr.msk.f32.mxu1 %vm159_vm1, %v141_v25 }
  0xee   :  { %583 = vmatmul.mubr.msk.f32.vlgmr.msra.gmra.mxu1 %vm159_vm1, %v565_v24 }
  0xef   :  { %605 = vmatpush3.msra.mxu1 %v565_v24  ;;  %608 = vmatprep.mubr.msk.f32.mxu1 %vm68_vm0, %v766_v2 }
  0xf0   :  { %606 = vmatprep.subr.mxu1 %v141_v25 }
  0xf1   :  { %607 = vmatpush3.msra.mxu1 %v141_v25 }
  0xf2   :  { %609 = vmatmul.mubr.msk.f32.vlgmr.msra.gmra.mxu1 %vm68_vm0, %v770_v3 }
  0xf9   :  { %v603_v34 = vpop.f32.mrf.mxu0 }
  0xfb   :  { %v313_v35 = vpop.f32.mrf.mxu0 }
 0x1ae   :  { %v584_v30 = vpop.f32.mrf.mxu1 }
 0x1af   :  { %v319_v36 = vadd.f32 %v603_v34, %v584_v30 }
 0x1b0   :  { %v232_v31 = vpop.f32.mrf.mxu1 }
 0x1b1   :  { %v314_v38 = vadd.f32 %v313_v35, %v232_v31 }
 0x1b2   :  { %v610_v32 = vpop.f32.mrf.mxu1 }
 0x1b4   :  { %v388_v33 = vpop.f32.mrf.mxu1 }
 0x1b5   :  { %627 = vmatprep.mubr.msk.f32.mxu0 %vm159_vm1, %v388_v33 }
 0x1b6   :  { %628 = vmatmul.mubr.msk.f32.vlgmr.msra.gmra.mxu0 %vm159_vm1, %v610_v32 }
 0x276   :  { %v629_v37 = vpop.f32.mrf.mxu0 }
 0x277   :  { %v488_v39 = vadd.f32 %v629_v37, %v319_v36 }
 0x278   :  { %v478_v40 = vpop.f32.mrf.mxu0 }
 0x279   :  { %v490_v41 = vmax.f32 %v488_v39, 0.0  ;;  %v487_v42 = vadd.f32 %v478_v40, %v314_v38 }
 0x27b   :  { %492 = vst.msk [vmem:[#allocation8 + $0x8] sm:$0xff] %vm159_vm1, %v490_v41  ;;  %v489_v43 = vmax.f32 %v487_v42, 0.0 }
 0x27d   :  { %491 = vst.msk [vmem:[#allocation8] sm:$0xff] %vm159_vm1, %v489_v43 }
 0x27e   :  { %707 = shalt.err (!%p704_p5)
}
 0x27f   :  { %504 = dma.vmem_to_hbm [thread:$0]  %s499_s2, 256, %s795_s3, [#allocation4], %s724_s17, %s724_s17, %s725_s18  }
 0x280   :  { %720 = dma.done.wait [#allocation4], 256  }
 0x281   :  { %721 = vsyncadd [#allocation4], 4294967040 }
 0x282   :  { %508 = vsyncpa [#allocation3], 1 }
 0x283   :  { %509 = vsyncpa [#allocation6], 1 }
 0x284   :  { %510 = vsyncpa [#allocation4], 1 }

// kernel: tpu_custom_call.1
= control target key start
LH: loop header
LB: loop body
LE: loop exit
PB: predicated region body
PF: predicated region fallthrough
CT: control target
= control target key end

     0   :  { %8 = vsyncpa [#allocation3], 0  ;;  %s792_s0 = inlined_call_operand.hbm [shape: f32[16,64], index: 0, kind: input, shape index: {}]   ;;  %s793_s1 = inlined_call_operand.hbm [shape: f32[16,16], index: 1, kind: input, shape index: {}]   ;;  %s794_s2 = inlined_call_operand.hbm [shape: f32[3,64,64], index: 2, kind: input, shape index: {}]   ;;  %s795_s3 = inlined_call_operand.hbm [shape: f32[16,64], index: 3, kind: output, shape index: {}]  }
   0x1   :  { %9 = vsyncpa [#allocation6], 0 }
   0x2   :  { %10 = vsyncpa [#allocation4], 0  ;;  %s722_s12 = smov [#allocation5]   ;;  %s723_s14 = smov [#allocation2]  }
   0x3   :  { %s28_s13 = sshll.u32 %s722_s12, 4  ;;  %s16_s15 = sshll.u32 %s723_s14, 4  ;;  %s29_s13 = int_to_ptr.vmem [resolvable:$true] %s28_s13  ;;  %s17_s15 = int_to_ptr.vmem [resolvable:$true] %s16_s15 }
   0x4   :  { %s644_s16 = scalar_lea.vmem %s29_s13, 256  ;;  %p649_p1 = scmp.lt.s32.totalorder %s29_s13, %s29_s13 }
   0x5   :  { %p645_p0 = scmp.ne.s32.totalorder %s29_s13, %s644_s16  ;;  %p650_p2 = scmp.lt.s32.totalorder %s644_s16, %s644_s16 }
   0x7   :  { %p651_p3 = por %p650_p2, %p649_p1 }
   0x9   :  { %p652_p4 = pnand %p651_p3, %p645_p0 }
   0xb   :  { %655 = shalt.err (!%p652_p4)
}
   0xc   :  { %s724_s17 = smov 128   ;;  %s725_s18 = smov 8  }
   0xd   :  { %34 = dma.hbm_to_vmem [thread:$0]  %s793_s1, 256, %s29_s13, [#allocation6], %s724_s17, %s724_s17, %s725_s18  }
   0xe   :  { %s664_s21 = scalar_lea.vmem %s17_s15, 256  ;;  %p669_p6 = scmp.lt.s32.totalorder %s17_s15, %s17_s15 }
   0xf   :  { %p665_p5 = scmp.ne.s32.totalorder %s17_s15, %s664_s21  ;;  %p670_p7 = scmp.lt.s32.totalorder %s664_s21, %s664_s21 }
  0x11   :  { %p671_p8 = por %p670_p7, %p669_p6 }
  0x13   :  { %p672_p9 = pnand %p671_p8, %p665_p5 }
  0x15   :  { %675 = shalt.err (!%p672_p9)
}
  0x16   :  { %22 = dma.hbm_to_vmem [thread:$0]  %s792_s0, 256, %s17_s15, [#allocation3], %s724_s17, %s724_s17, %s725_s18  }
  0x17   :  { %s726_s24 = smov [#allocation7]  }
  0x18   :  { %s40_s25 = sshll.u32 %s726_s24, 4  ;;  %s41_s25 = int_to_ptr.vmem [resolvable:$true] %s40_s25 }
  0x19   :  { %s684_s26 = scalar_lea.vmem %s41_s25, 3072  ;;  %p689_p11 = scmp.lt.s32.totalorder %s41_s25, %s41_s25 }
  0x1a   :  { %p685_p10 = scmp.ne.s32.totalorder %s41_s25, %s684_s26  ;;  %p690_p12 = scmp.lt.s32.totalorder %s684_s26, %s684_s26 }
  0x1c   :  { %p691_p13 = por %p690_p12, %p689_p11 }
  0x1e   :  { %p692_p0 = pnand %p691_p13, %p685_p10 }
  0x20   :  { %695 = shalt.err (!%p692_p0)
}
  0x21   :  { %46 = dma.hbm_to_vmem [thread:$0]  %s794_s2, 3072, %s41_s25, [#allocation6], %s724_s17, %s724_s17, %s725_s18  }
  0x22   :  { %716 = dma.done.wait [#allocation3], 256  }
  0x23   :  { %717 = vsyncadd [#allocation3], 4294967040 }
  0x24   :  { %718 = dma.done.wait [#allocation6], 3328  }
  0x25   :  { %719 = vsyncadd [#allocation6], 4294963968  ;;  %vm68_vm0 = vcmask 130048   ;;  %v59_v0 = vld [vmem:[#allocation2 + $0x8] sm:$0xff]  ;;  %v58_v1 = vld [vmem:[#allocation2] sm:$0xff]  ;;  %vm159_vm1 = vcmask 523264  }
  0x26   :  { %v766_v2 = vld [vmem:[#allocation5] sm:$0xff]  ;;  %559 = vmatprep.subr.mxu1 %v59_v0  ;;  %v770_v3 = vld [vmem:[#allocation5 + $0x8] sm:$0xff]  ;;  %v65_v8 = vld [vmem:[#allocation7 + $0x28] sm:$0xff]  ;;  %601 = vmatprep.mubr.msk.f32.mxu0 %vm159_vm1, %v58_v1  ;;  %s727_s0 = smov [#allocation8]  }
  0x27   :  { %563 = vmatprep.mubr.msk.f32.mxu1 %vm68_vm0, %v766_v2  ;;  %560 = vmatpush3.msra.mxu1 %v59_v0  ;;  %v158_v4 = vld [vmem:[#allocation7 + $0x78] sm:$0xff]  ;;  %v66_v6 = vld [vmem:[#allocation7 + $0x30] sm:$0xff]  ;;  %v156_v9 = vld [vmem:[#allocation7 + $0x68] sm:$0xff]  ;;  %s498_s2 = sshll.u32 %s727_s0, 4  ;;  %s499_s2 = int_to_ptr.vmem [resolvable:$true] %s498_s2 }
  0x28   :  { %v67_v5 = vld [vmem:[#allocation7 + $0x38] sm:$0xff]  ;;  %561 = vmatprep.subr.mxu1 %v58_v1  ;;  %v157_v7 = vld [vmem:[#allocation7 + $0x70] sm:$0xff]  ;;  %v64_v10 = vld [vmem:[#allocation7 + $0x20] sm:$0xff]  ;;  %s696_s28 = scalar_lea.vmem %s499_s2, 256  ;;  %p701_p2 = scmp.lt.s32.totalorder %s499_s2, %s499_s2 }
  0x29   :  { %585 = vmatprep.subr.mxu0 %v67_v5  ;;  %562 = vmatpush3.msra.mxu1 %v58_v1  ;;  %v155_v11 = vld [vmem:[#allocation7 + $0x60] sm:$0xff]  ;;  %v63_v12 = vld [vmem:[#allocation7 + $0x18] sm:$0xff]  ;;  %v62_v14 = vld [vmem:[#allocation7 + $0x10] sm:$0xff]  ;;  %p697_p1 = scmp.ne.s32.totalorder %s499_s2, %s696_s28  ;;  %p702_p3 = scmp.lt.s32.totalorder %s696_s28, %s696_s28 }
  0x2a   :  { %586 = vmatpush3.msra.mxu0 %v67_v5  ;;  %564 = vmatmul.mubr.msk.f32.vlgmr.msra.gmra.mxu1 %vm68_vm0, %v770_v3  ;;  %v154_v13 = vld [vmem:[#allocation7 + $0x58] sm:$0xff]  ;;  %v153_v15 = vld [vmem:[#allocation7 + $0x50] sm:$0xff]  ;;  %v152_v16 = vld [vmem:[#allocation7 + $0x48] sm:$0xff] }
  0x2b   :  { %566 = vmatprep.subr.mxu1 %v158_v4  ;;  %587 = vmatprep.subr.mxu0 %v66_v6  ;;  %v151_v17 = vld [vmem:[#allocation7 + $0x40] sm:$0xff]  ;;  %v61_v18 = vld [vmem:[#allocation7 + $0x8] sm:$0xff]  ;;  %v405_v20 = vld [vmem:[#allocation7 + $0xb8] sm:$0xff]  ;;  %p703_p4 = por %p702_p3, %p701_p2 }
  0x2c   :  { %567 = vmatpush3.msra.mxu1 %v158_v4  ;;  %588 = vmatpush3.msra.mxu0 %v66_v6  ;;  %v60_v19 = vld [vmem:[#allocation7] sm:$0xff]  ;;  %v404_v21 = vld [vmem:[#allocation7 + $0xb0] sm:$0xff]  ;;  %v403_v22 = vld [vmem:[#allocation7 + $0xa8] sm:$0xff] }
  0x2d   :  { %568 = vmatprep.subr.mxu1 %v157_v7  ;;  %589 = vmatprep.subr.mxu0 %v65_v8  ;;  %v402_v23 = vld [vmem:[#allocation7 + $0xa0] sm:$0xff]  ;;  %v401_v26 = vld [vmem:[#allocation7 + $0x98] sm:$0xff]  ;;  %v400_v27 = vld [vmem:[#allocation7 + $0x90] sm:$0xff]  ;;  %p704_p5 = pnand %p703_p4, %p697_p1 }
  0x2e   :  { %569 = vmatpush3.msra.mxu1 %v157_v7  ;;  %590 = vmatpush3.msra.mxu0 %v65_v8  ;;  %v399_v28 = vld [vmem:[#allocation7 + $0x88] sm:$0xff]  ;;  %v398_v29 = vld [vmem:[#allocation7 + $0x80] sm:$0xff] }
  0x2f   :  { %570 = vmatprep.subr.mxu1 %v156_v9  ;;  %591 = vmatprep.subr.mxu0 %v64_v10 }
  0x30   :  { %571 = vmatpush3.msra.mxu1 %v156_v9  ;;  %592 = vmatpush3.msra.mxu0 %v64_v10 }
  0x31   :  { %572 = vmatprep.subr.mxu1 %v155_v11  ;;  %593 = vmatprep.subr.mxu0 %v63_v12 }
  0x32   :  { %573 = vmatpush3.msra.mxu1 %v155_v11  ;;  %594 = vmatpush3.msra.mxu0 %v63_v12 }
  0x33   :  { %574 = vmatprep.subr.mxu1 %v154_v13  ;;  %595 = vmatprep.subr.mxu0 %v62_v14 }
  0x34   :  { %575 = vmatpush3.msra.mxu1 %v154_v13  ;;  %596 = vmatpush3.msra.mxu0 %v62_v14 }
  0x35   :  { %576 = vmatprep.subr.mxu1 %v153_v15  ;;  %597 = vmatprep.subr.mxu0 %v61_v18 }
  0x36   :  { %577 = vmatpush3.msra.mxu1 %v153_v15  ;;  %598 = vmatpush3.msra.mxu0 %v61_v18 }
  0x37   :  { %578 = vmatprep.subr.mxu1 %v152_v16  ;;  %599 = vmatprep.subr.mxu0 %v60_v19 }
  0x38   :  { %579 = vmatpush3.msra.mxu1 %v152_v16  ;;  %600 = vmatpush3.msra.mxu0 %v60_v19 }
  0x39   :  { %580 = vmatprep.subr.mxu1 %v151_v17  ;;  %602 = vmatmul.mubr.msk.f32.vlgmr.msra.gmra.mxu0 %vm159_vm1, %v59_v0 }
  0x3a   :  { %581 = vmatpush3.msra.mxu1 %v151_v17  ;;  %611 = vmatprep.subr.mxu0 %v405_v20 }
  0x3b   :  { %612 = vmatpush3.msra.mxu0 %v405_v20 }
  0x3c   :  { %613 = vmatprep.subr.mxu0 %v404_v21 }
  0x3d   :  { %614 = vmatpush3.msra.mxu0 %v404_v21 }
  0x3e   :  { %615 = vmatprep.subr.mxu0 %v403_v22 }
  0x3f   :  { %616 = vmatpush3.msra.mxu0 %v403_v22 }
  0x40   :  { %617 = vmatprep.subr.mxu0 %v402_v23 }
  0x41   :  { %618 = vmatpush3.msra.mxu0 %v402_v23 }
  0x42   :  { %619 = vmatprep.subr.mxu0 %v401_v26 }
  0x43   :  { %620 = vmatpush3.msra.mxu0 %v401_v26 }
  0x44   :  { %621 = vmatprep.subr.mxu0 %v400_v27 }
  0x45   :  { %622 = vmatpush3.msra.mxu0 %v400_v27 }
  0x46   :  { %623 = vmatprep.subr.mxu0 %v399_v28 }
  0x47   :  { %624 = vmatpush3.msra.mxu0 %v399_v28 }
  0x48   :  { %625 = vmatprep.subr.mxu0 %v398_v29 }
  0x49   :  { %626 = vmatpush3.msra.mxu0 %v398_v29 }
  0xea   :  { %v565_v24 = vpop.f32.mrf.mxu1 }
  0xeb   :  { %604 = vmatprep.subr.mxu1 %v565_v24 }
  0xec   :  { %v141_v25 = vpop.f32.mrf.mxu1 }
  0xed   :  { %582 = vmatprep.mubr.msk.f32.mxu1 %vm159_vm1, %v141_v25 }
  0xee   :  { %583 = vmatmul.mubr.msk.f32.vlgmr.msra.gmra.mxu1 %vm159_vm1, %v565_v24 }
  0xef   :  { %605 = vmatpush3.msra.mxu1 %v565_v24  ;;  %608 = vmatprep.mubr.msk.f32.mxu1 %vm68_vm0, %v766_v2 }
  0xf0   :  { %606 = vmatprep.subr.mxu1 %v141_v25 }
  0xf1   :  { %607 = vmatpush3.msra.mxu1 %v141_v25 }
  0xf2   :  { %609 = vmatmul.mubr.msk.f32.vlgmr.msra.gmra.mxu1 %vm68_vm0, %v770_v3 }
  0xf9   :  { %v603_v34 = vpop.f32.mrf.mxu0 }
  0xfb   :  { %v313_v35 = vpop.f32.mrf.mxu0 }
 0x1ae   :  { %v584_v30 = vpop.f32.mrf.mxu1 }
 0x1af   :  { %v319_v36 = vadd.f32 %v603_v34, %v584_v30 }
 0x1b0   :  { %v232_v31 = vpop.f32.mrf.mxu1 }
 0x1b1   :  { %v314_v38 = vadd.f32 %v313_v35, %v232_v31 }
 0x1b2   :  { %v610_v32 = vpop.f32.mrf.mxu1 }
 0x1b4   :  { %v388_v33 = vpop.f32.mrf.mxu1 }
 0x1b5   :  { %627 = vmatprep.mubr.msk.f32.mxu0 %vm159_vm1, %v388_v33 }
 0x1b6   :  { %628 = vmatmul.mubr.msk.f32.vlgmr.msra.gmra.mxu0 %vm159_vm1, %v610_v32 }
 0x276   :  { %v629_v37 = vpop.f32.mrf.mxu0 }
 0x277   :  { %v488_v39 = vadd.f32 %v629_v37, %v319_v36 }
 0x278   :  { %v478_v40 = vpop.f32.mrf.mxu0 }
 0x279   :  { %v490_v41 = vmax.f32 %v488_v39, 0.0  ;;  %v487_v42 = vadd.f32 %v478_v40, %v314_v38 }
 0x27b   :  { %492 = vst.msk [vmem:[#allocation8 + $0x8] sm:$0xff] %vm159_vm1, %v490_v41  ;;  %v489_v43 = vmax.f32 %v487_v42, 0.0 }
 0x27d   :  { %491 = vst.msk [vmem:[#allocation8] sm:$0xff] %vm159_vm1, %v489_v43 }
 0x27e   :  { %707 = shalt.err (!%p704_p5)
}
 0x27f   :  { %504 = dma.vmem_to_hbm [thread:$0]  %s499_s2, 256, %s795_s3, [#allocation4], %s724_s17, %s724_s17, %s725_s18  }
 0x280   :  { %720 = dma.done.wait [#allocation4], 256  }
 0x281   :  { %721 = vsyncadd [#allocation4], 4294967040 }
 0x282   :  { %508 = vsyncpa [#allocation3], 1 }
 0x283   :  { %509 = vsyncpa [#allocation6], 1 }
 0x284   :  { %510 = vsyncpa [#allocation4], 1 }

</bundles_post_ra>
